<compile_context>
chip_gen: v6e
topology: v6e:2x2x1
jax: 0.10.0
libtpu: 0.0.40
codegen_flags: <defaults>
</compile_context>

<pallas_src>
import numpy as np
import jax
import jax.numpy as jnp
from jax.experimental import pallas as pl
from jax.experimental.pallas import tpu as pltpu

LANE = 128
SUBLANE = 8


# ----------------------------------------------------------------------------
# Static metadata derived from the irreps (mirrors z_rotation_infos)
# ----------------------------------------------------------------------------
def build_z_rotation_metadata(irreps_ls):
    """irreps_ls: list of l values (each contributes 2l+1 consecutive m indices)."""
    m_to_info = {}
    lm_to_idx = {}
    cur = 0
    max_l = 0
    for irrep_idx, l in enumerate(irreps_ls):
        max_l = max(max_l, l)
        for m in range(-l, l + 1):
            m_to_info[cur] = (irrep_idx, l, m)
            lm_to_idx[(irrep_idx, l, m)] = cur
            cur += 1
    dim = cur

    absm = np.zeros((dim,), dtype=np.float32)      # |m| per output index M
    negsign = np.zeros((dim,), dtype=np.float32)   # -sign(m) per output index M (0 for m=0)
    partner = np.zeros((dim,), dtype=np.int32)     # index of (l, -m) within the same irrep
    for M in range(dim):
        irrep_idx, l, m = m_to_info[M]
        absm[M] = abs(m)
        negsign[M] = -(float(m > 0) - float(m < 0))
        partner[M] = lm_to_idx[(irrep_idx, l, -m)]

    # Sparse-product lists (exact port of z_rotation_infos) -- used by the pure-JAX reference.
    indices1, indices2, indices_out, scales = [], [], [], []
    for M in range(dim):
        irrep_idx, l, m = m_to_info[M]
        if m == 0:
            indices_out.append(M); scales.append(1.0)
            indices1.append(M);    indices2.append(0)
        else:
            abs_m = abs(m)
            sign_m = float(m > 0) - float(m < 0)
            M_neg = lm_to_idx[(irrep_idx, l, -m)]
            indices_out.append(M); scales.append(1.0)
            indices1.append(M);    indices2.append(2 * abs_m)
            indices_out.append(M); scales.append(-sign_m)
            indices1.append(M_neg); indices2.append(2 * abs_m - 1)

    sparse_lists = (indices1, indices2, indices_out, scales)
    return dim, max_l, absm, negsign, partner, sparse_lists


# ----------------------------------------------------------------------------
# Pallas kernel
# ----------------------------------------------------------------------------
def _make_wigner_z_kernel(dim, C, partner):
    partner = tuple(int(p) for p in partner)   # static: baked into the trace

    def kernel(cos_ref, nsin_ref, x_ref, o_ref):
        # cos_ref / nsin_ref : (tb, dim)      per-row rotation coefficients
        # x_ref   / o_ref    : (tb, dim*C)    flattened (batch, M*C) data
        #
        # Static per-M loop (dim is small, e.g. 16).  Each slab slice below is a
        # lane-tile-aligned, multiple-of-128 column range -> unit-stride vreg loads and
        # full-width unmasked stores; the partner "gather" is just a different static slab.
        for M in range(dim):
            p = partner[M]
            xs = x_ref[:, M * C:(M + 1) * C]          # x[:, M, :]
            xp = x_ref[:, p * C:(p + 1) * C]          # x[:, (l, -m), :]
            c = cos_ref[:, M:M + 1]                   # (tb, 1): lane-splat over C
            s = nsin_ref[:, M:M + 1]                  # (tb, 1)
            o_ref[:, M * C:(M + 1) * C] = c * xs + s * xp

    return kernel


def wigner_rotation_z(x, angle, irreps_ls, *, block_batch=None,
                      target_block_bytes=4 * 1024 * 1024, min_grid_steps=4):
    """x: (N, dim, C) float, angle: (N,) float -> (N, dim, C) float32."""
    dim, _max_l, absm_np, negsign_np, partner_np, _ = build_z_rotation_metadata(irreps_ls)
    N, d, C = x.shape
    if d != dim:
        raise ValueError(f"x.shape[1]={d} does not match irreps dim={dim}")

    x = x.astype(jnp.float32)
    angle = angle.astype(jnp.float32)

    # Lane alignment: pad channels to a multiple of 128 so every per-M slab is vreg-aligned
    # and output stores are lane-dense.  Demo uses C=128 -> no copy is made.
    C_pad = ((C + LANE - 1) // LANE) * LANE
    if C_pad != C:
        x = jnp.pad(x, ((0, 0), (0, 0), (0, C_pad - C)))
    x2 = x.reshape(N, dim * C_pad)    # free reshape (row-major)

    # Precompute the per-(row, M) rotation coefficients in XLA.  These tables are tiny
    # (2 * N * dim f32, ~2/C of the x traffic) and remove all trig / EUP work from the kernel.
    absm = jnp.asarray(absm_np)                      # (dim,)
    negs = jnp.asarray(negsign_np)                   # (dim,)
    ma = angle[:, None] * absm[None, :]              # (N, dim)
    cos_tab = jnp.cos(ma)                            # cos(|m| * phi)
    nsin_tab = negs[None, :] * jnp.sin(ma)           # -sign(m) * sin(|m| * phi)

    # Batch tile: ~4 MiB blocks amortize the ~0.35 us per-grid-step overhead while the
    # double-buffered in+out footprint (~4x block) stays under the 32 MiB vmem limit we
    # request (fits v5e/v6e/v7x).  When N is small, cap the tile so the grid still has a
    # few steps (v7x megacore overlap) instead of a 1-step grid.
    row_bytes = dim * C_pad * 4
    if block_batch is not None:
        tb = max(SUBLANE, (block_batch // SUBLANE) * SUBLANE)
    else:
        tb = max(SUBLANE, (target_block_bytes // row_bytes) // SUBLANE * SUBLANE)
        rows_per_step = -(-max(N, 1) // min_grid_steps)
        tb_cap = max(SUBLANE, ((rows_per_step + SUBLANE - 1) // SUBLANE) * SUBLANE)
        tb = min(tb, tb_cap)

    grid = (pl.cdiv(N, tb),)   # ragged tail handled by Pallas boundary masking (no jnp.pad of x)

    kernel = _make_wigner_z_kernel(dim, C_pad, partner_np)

    out2 = pl.pallas_call(
        kernel,
        out_shape=jax.ShapeDtypeStruct((N, dim * C_pad), jnp.float32),
        grid_spec=pltpu.PrefetchScalarGridSpec(
            num_scalar_prefetch=0,
            grid=grid,
            in_specs=[
                pl.BlockSpec((tb, dim), lambda n: (n, 0)),            # cos(|m| phi)
                pl.BlockSpec((tb, dim), lambda n: (n, 0)),            # -sign(m) sin(|m| phi)
                pl.BlockSpec((tb, dim * C_pad), lambda n: (n, 0)),    # x (flattened, lane-dense)
            ],
            out_specs=pl.BlockSpec((tb, dim * C_pad), lambda n: (n, 0)),
        ),
        compiler_params=pltpu.CompilerParams(
            dimension_semantics=("parallel",),      # megacore sharding of batch tiles (v7x)
            vmem_limit_bytes=32 * 1024 * 1024,      # clears v5e 16 MiB default, < v7x 64 MiB phys
        ),
        cost_estimate=pl.CostEstimate(
            flops=3 * N * dim * C_pad,
            transcendentals=0,
            bytes_accessed=(2 * N * dim * C_pad + 2 * N * dim) * 4,
        ),
    )(cos_tab, nsin_tab, x2)

    out = out2.reshape(N, dim, C_pad)
    if C_pad != C:
        out = out[:, :, :C]
    return out


# ----------------------------------------------------------------------------
# Pure-JAX reference: exact port of prepare_sincos + sparse_vecsca semantics
# ----------------------------------------------------------------------------
def prepare_sincos_ref(angle, max_m):
    m = jnp.arange(1, max_m + 1, dtype=angle.dtype)
    m_angle = angle[:, None] * m                                  # (N, max_m)
    sin = jnp.sin(m_angle)
    cos = jnp.cos(m_angle)
    ones = jnp.ones_like(angle)[:, None]
    inter = jnp.stack([sin, cos], axis=-1).reshape(angle.shape[0], -1)
    return jnp.concatenate([ones, inter], axis=-1)                # (N, 1 + 2*max_m)


def wigner_rotation_z_ref(x, angle, max_m, sparse_lists):
    indices1, indices2, indices_out, scales = sparse_lists
    sincos = prepare_sincos_ref(angle, max_m)
    out = jnp.zeros_like(x)
    for t in range(len(indices_out)):
        out = out.at[:, indices_out[t], :].add(
            scales[t] * x[:, indices1[t], :] * sincos[:, indices2[t]][:, None]
        )
    return out


# ----------------------------------------------------------------------------
# TODO(synk): only the forward pass is implemented; the module's custom backward
# infos (info_bwd_input / info_bwd_sincos) are not ported.
# ----------------------------------------------------------------------------
if __name__ == "__main__":
    # Irreps: l = 0, 1, 2, 3  ->  dim = 1 + 3 + 5 + 7 = 16, max_m = 3
    irreps_ls = [0, 1, 2, 3]
    dim, max_l, absm_np, negsign_np, partner_np, sparse_lists = \
        build_z_rotation_metadata(irreps_ls)

    N, C = 16, 128    # C = 128 keeps every slab / store lane-dense
    key = jax.random.PRNGKey(0)
    kx, ka = jax.random.split(key)
    x = jax.random.normal(kx, (N, dim, C), dtype=jnp.float32)
    angle = jax.random.uniform(ka, (N,), dtype=jnp.float32, minval=-3.0, maxval=3.0)

    out = wigner_rotation_z(x, angle, irreps_ls)
    out = jax.block_until_ready(out)

    ref = wigner_rotation_z_ref(x, angle, max_l, sparse_lists)
    ref = jax.block_until_ready(ref)

    np.testing.assert_allclose(np.asarray(out), np.asarray(ref), rtol=1e-5, atol=1e-5)
    print("KERNEL_OK")
</pallas_src>

<mosaic_0001>
module attributes {stable_mosaic.version = 11 : i64} {
  func.func @kernel(%arg0: i32, %arg1: memref<8x16xf32, #tpu.memory_space<vmem>>, %arg2: memref<8x16xf32, #tpu.memory_space<vmem>>, %arg3: memref<8x2048xf32, #tpu.memory_space<vmem>>, %arg4: memref<8x2048xf32, #tpu.memory_space<vmem>>) attributes {dimension_semantics = [#tpu.dimension_semantics<parallel>], iteration_bounds = array<i64: 2>, scalar_prefetch = 0 : i64, scratch_operands = 0 : i64, tpu.core_type = #tpu.core_type<tc>, window_params = [{transform_indices = @transform_0, window_bounds = array<i64: 8, 16>}, {transform_indices = @transform_1, window_bounds = array<i64: 8, 16>}, {transform_indices = @transform_2, window_bounds = array<i64: 8, 2048>}, {transform_indices = @transform_3, window_bounds = array<i64: 8, 2048>}]} {
    %c0 = arith.constant 0 : index
    %c0_0 = arith.constant 0 : index
    %0 = vector.load %arg3[%c0, %c0_0] : memref<8x2048xf32, #tpu.memory_space<vmem>>, vector<8x128xf32>
    %c0_1 = arith.constant 0 : index
    %c0_2 = arith.constant 0 : index
    %1 = vector.load %arg3[%c0_1, %c0_2] : memref<8x2048xf32, #tpu.memory_space<vmem>>, vector<8x128xf32>
    %c0_3 = arith.constant 0 : index
    %c0_4 = arith.constant 0 : index
    %2 = vector.load %arg1[%c0_3, %c0_4] : memref<8x16xf32, #tpu.memory_space<vmem>>, vector<8x1xf32>
    %c0_5 = arith.constant 0 : index
    %c0_6 = arith.constant 0 : index
    %3 = vector.load %arg2[%c0_5, %c0_6] : memref<8x16xf32, #tpu.memory_space<vmem>>, vector<8x1xf32>
    %4 = vector.broadcast %2 : vector<8x1xf32> to vector<8x128xf32>
    %5 = arith.mulf %4, %0 : vector<8x128xf32>
    %6 = vector.broadcast %3 : vector<8x1xf32> to vector<8x128xf32>
    %7 = arith.mulf %6, %1 : vector<8x128xf32>
    %8 = arith.addf %5, %7 : vector<8x128xf32>
    %c0_7 = arith.constant 0 : index
    %c0_8 = arith.constant 0 : index
    %9 = vector.load %arg4[%c0_7, %c0_8] : memref<8x2048xf32, #tpu.memory_space<vmem>>, vector<8x128xf32>
    tpu.vector_store %arg4[%c0_7, %c0_8], %8 {strides = array<i32>} : memref<8x2048xf32, #tpu.memory_space<vmem>>, vector<8x128xf32>,
    %c0_9 = arith.constant 0 : index
    %c128 = arith.constant 128 : index
    %10 = vector.load %arg3[%c0_9, %c128] : memref<8x2048xf32, #tpu.memory_space<vmem>>, vector<8x128xf32>
    %c0_10 = arith.constant 0 : index
    %c384 = arith.constant 384 : index
    %11 = vector.load %arg3[%c0_10, %c384] : memref<8x2048xf32, #tpu.memory_space<vmem>>, vector<8x128xf32>
    %c0_11 = arith.constant 0 : index
    %c1 = arith.constant 1 : index
    %12 = vector.load %arg1[%c0_11, %c1] : memref<8x16xf32, #tpu.memory_space<vmem>>, vector<8x1xf32>
    %c0_12 = arith.constant 0 : index
    %c1_13 = arith.constant 1 : index
    %13 = vector.load %arg2[%c0_12, %c1_13] : memref<8x16xf32, #tpu.memory_space<vmem>>, vector<8x1xf32>
    %14 = vector.broadcast %12 : vector<8x1xf32> to vector<8x128xf32>
    %15 = arith.mulf %14, %10 : vector<8x128xf32>
    %16 = vector.broadcast %13 : vector<8x1xf32> to vector<8x128xf32>
    %17 = arith.mulf %16, %11 : vector<8x128xf32>
    %18 = arith.addf %15, %17 : vector<8x128xf32>
    %c0_14 = arith.constant 0 : index
    %c128_15 = arith.constant 128 : index
    %19 = vector.load %arg4[%c0_14, %c128_15] : memref<8x2048xf32, #tpu.memory_space<vmem>>, vector<8x128xf32>
    tpu.vector_store %arg4[%c0_14, %c128_15], %18 {strides = array<i32>} : memref<8x2048xf32, #tpu.memory_space<vmem>>, vector<8x128xf32>,
    %c0_16 = arith.constant 0 : index
    %c256 = arith.constant 256 : index
    %20 = vector.load %arg3[%c0_16, %c256] : memref<8x2048xf32, #tpu.memory_space<vmem>>, vector<8x128xf32>
    %c0_17 = arith.constant 0 : index
    %c256_18 = arith.constant 256 : index
    %21 = vector.load %arg3[%c0_17, %c256_18] : memref<8x2048xf32, #tpu.memory_space<vmem>>, vector<8x128xf32>
    %c0_19 = arith.constant 0 : index
    %c2 = arith.constant 2 : index
    %22 = vector.load %arg1[%c0_19, %c2] : memref<8x16xf32, #tpu.memory_space<vmem>>, vector<8x1xf32>
    %c0_20 = arith.constant 0 : index
    %c2_21 = arith.constant 2 : index
    %23 = vector.load %arg2[%c0_20, %c2_21] : memref<8x16xf32, #tpu.memory_space<vmem>>, vector<8x1xf32>
    %24 = vector.broadcast %22 : vector<8x1xf32> to vector<8x128xf32>
    %25 = arith.mulf %24, %20 : vector<8x128xf32>
    %26 = vector.broadcast %23 : vector<8x1xf32> to vector<8x128xf32>
    %27 = arith.mulf %26, %21 : vector<8x128xf32>
    %28 = arith.addf %25, %27 : vector<8x128xf32>
    %c0_22 = arith.constant 0 : index
    %c256_23 = arith.constant 256 : index
    %29 = vector.load %arg4[%c0_22, %c256_23] : memref<8x2048xf32, #tpu.memory_space<vmem>>, vector<8x128xf32>
    tpu.vector_store %arg4[%c0_22, %c256_23], %28 {strides = array<i32>} : memref<8x2048xf32, #tpu.memory_space<vmem>>, vector<8x128xf32>,
    %c0_24 = arith.constant 0 : index
    %c384_25 = arith.constant 384 : index
    %30 = vector.load %arg3[%c0_24, %c384_25] : memref<8x2048xf32, #tpu.memory_space<vmem>>, vector<8x128xf32>
    %c0_26 = arith.constant 0 : index
    %c128_27 = arith.constant 128 : index
    %31 = vector.load %arg3[%c0_26, %c128_27] : memref<8x2048xf32, #tpu.memory_space<vmem>>, vector<8x128xf32>
    %c0_28 = arith.constant 0 : index
    %c3 = arith.constant 3 : index
    %32 = vector.load %arg1[%c0_28, %c3] : memref<8x16xf32, #tpu.memory_space<vmem>>, vector<8x1xf32>
    %c0_29 = arith.constant 0 : index
    %c3_30 = arith.constant 3 : index
    %33 = vector.load %arg2[%c0_29, %c3_30] : memref<8x16xf32, #tpu.memory_space<vmem>>, vector<8x1xf32>
    %34 = vector.broadcast %32 : vector<8x1xf32> to vector<8x128xf32>
    %35 = arith.mulf %34, %30 : vector<8x128xf32>
    %36 = vector.broadcast %33 : vector<8x1xf32> to vector<8x128xf32>
    %37 = arith.mulf %36, %31 : vector<8x128xf32>
    %38 = arith.addf %35, %37 : vector<8x128xf32>
    %c0_31 = arith.constant 0 : index
    %c384_32 = arith.constant 384 : index
    %39 = vector.load %arg4[%c0_31, %c384_32] : memref<8x2048xf32, #tpu.memory_space<vmem>>, vector<8x128xf32>
    tpu.vector_store %arg4[%c0_31, %c384_32], %38 {strides = array<i32>} : memref<8x2048xf32, #tpu.memory_space<vmem>>, vector<8x128xf32>,
    %c0_33 = arith.constant 0 : index
    %c512 = arith.constant 512 : index
    %40 = vector.load %arg3[%c0_33, %c512] : memref<8x2048xf32, #tpu.memory_space<vmem>>, vector<8x128xf32>
    %c0_34 = arith.constant 0 : index
    %c1024 = arith.constant 1024 : index
    %41 = vector.load %arg3[%c0_34, %c1024] : memref<8x2048xf32, #tpu.memory_space<vmem>>, vector<8x128xf32>
    %c0_35 = arith.constant 0 : index
    %c4 = arith.constant 4 : index
    %42 = vector.load %arg1[%c0_35, %c4] : memref<8x16xf32, #tpu.memory_space<vmem>>, vector<8x1xf32>
    %c0_36 = arith.constant 0 : index
    %c4_37 = arith.constant 4 : index
    %43 = vector.load %arg2[%c0_36, %c4_37] : memref<8x16xf32, #tpu.memory_space<vmem>>, vector<8x1xf32>
    %44 = vector.broadcast %42 : vector<8x1xf32> to vector<8x128xf32>
    %45 = arith.mulf %44, %40 : vector<8x128xf32>
    %46 = vector.broadcast %43 : vector<8x1xf32> to vector<8x128xf32>
    %47 = arith.mulf %46, %41 : vector<8x128xf32>
    %48 = arith.addf %45, %47 : vector<8x128xf32>
    %c0_38 = arith.constant 0 : index
    %c512_39 = arith.constant 512 : index
    %49 = vector.load %arg4[%c0_38, %c512_39] : memref<8x2048xf32, #tpu.memory_space<vmem>>, vector<8x128xf32>
    tpu.vector_store %arg4[%c0_38, %c512_39], %48 {strides = array<i32>} : memref<8x2048xf32, #tpu.memory_space<vmem>>, vector<8x128xf32>,
    %c0_40 = arith.constant 0 : index
    %c640 = arith.constant 640 : index
    %50 = vector.load %arg3[%c0_40, %c640] : memref<8x2048xf32, #tpu.memory_space<vmem>>, vector<8x128xf32>
    %c0_41 = arith.constant 0 : index
    %c896 = arith.constant 896 : index
    %51 = vector.load %arg3[%c0_41, %c896] : memref<8x2048xf32, #tpu.memory_space<vmem>>, vector<8x128xf32>
    %c0_42 = arith.constant 0 : index
    %c5 = arith.constant 5 : index
    %52 = vector.load %arg1[%c0_42, %c5] : memref<8x16xf32, #tpu.memory_space<vmem>>, vector<8x1xf32>
    %c0_43 = arith.constant 0 : index
    %c5_44 = arith.constant 5 : index
    %53 = vector.load %arg2[%c0_43, %c5_44] : memref<8x16xf32, #tpu.memory_space<vmem>>, vector<8x1xf32>
    %54 = vector.broadcast %52 : vector<8x1xf32> to vector<8x128xf32>
    %55 = arith.mulf %54, %50 : vector<8x128xf32>
    %56 = vector.broadcast %53 : vector<8x1xf32> to vector<8x128xf32>
    %57 = arith.mulf %56, %51 : vector<8x128xf32>
    %58 = arith.addf %55, %57 : vector<8x128xf32>
    %c0_45 = arith.constant 0 : index
    %c640_46 = arith.constant 640 : index
    %59 = vector.load %arg4[%c0_45, %c640_46] : memref<8x2048xf32, #tpu.memory_space<vmem>>, vector<8x128xf32>
    tpu.vector_store %arg4[%c0_45, %c640_46], %58 {strides = array<i32>} : memref<8x2048xf32, #tpu.memory_space<vmem>>, vector<8x128xf32>,
    %c0_47 = arith.constant 0 : index
    %c768 = arith.constant 768 : index
    %60 = vector.load %arg3[%c0_47, %c768] : memref<8x2048xf32, #tpu.memory_space<vmem>>, vector<8x128xf32>
    %c0_48 = arith.constant 0 : index
    %c768_49 = arith.constant 768 : index
    %61 = vector.load %arg3[%c0_48, %c768_49] : memref<8x2048xf32, #tpu.memory_space<vmem>>, vector<8x128xf32>
    %c0_50 = arith.constant 0 : index
    %c6 = arith.constant 6 : index
    %62 = vector.load %arg1[%c0_50, %c6] : memref<8x16xf32, #tpu.memory_space<vmem>>, vector<8x1xf32>
    %c0_51 = arith.constant 0 : index
    %c6_52 = arith.constant 6 : index
    %63 = vector.load %arg2[%c0_51, %c6_52] : memref<8x16xf32, #tpu.memory_space<vmem>>, vector<8x1xf32>
    %64 = vector.broadcast %62 : vector<8x1xf32> to vector<8x128xf32>
    %65 = arith.mulf %64, %60 : vector<8x128xf32>
    %66 = vector.broadcast %63 : vector<8x1xf32> to vector<8x128xf32>
    %67 = arith.mulf %66, %61 : vector<8x128xf32>
    %68 = arith.addf %65, %67 : vector<8x128xf32>
    %c0_53 = arith.constant 0 : index
    %c768_54 = arith.constant 768 : index
    %69 = vector.load %arg4[%c0_53, %c768_54] : memref<8x2048xf32, #tpu.memory_space<vmem>>, vector<8x128xf32>
    tpu.vector_store %arg4[%c0_53, %c768_54], %68 {strides = array<i32>} : memref<8x2048xf32, #tpu.memory_space<vmem>>, vector<8x128xf32>,
    %c0_55 = arith.constant 0 : index
    %c896_56 = arith.constant 896 : index
    %70 = vector.load %arg3[%c0_55, %c896_56] : memref<8x2048xf32, #tpu.memory_space<vmem>>, vector<8x128xf32>
    %c0_57 = arith.constant 0 : index
    %c640_58 = arith.constant 640 : index
    %71 = vector.load %arg3[%c0_57, %c640_58] : memref<8x2048xf32, #tpu.memory_space<vmem>>, vector<8x128xf32>
    %c0_59 = arith.constant 0 : index
    %c7 = arith.constant 7 : index
    %72 = vector.load %arg1[%c0_59, %c7] : memref<8x16xf32, #tpu.memory_space<vmem>>, vector<8x1xf32>
    %c0_60 = arith.constant 0 : index
    %c7_61 = arith.constant 7 : index
    %73 = vector.load %arg2[%c0_60, %c7_61] : memref<8x16xf32, #tpu.memory_space<vmem>>, vector<8x1xf32>
    %74 = vector.broadcast %72 : vector<8x1xf32> to vector<8x128xf32>
    %75 = arith.mulf %74, %70 : vector<8x128xf32>
    %76 = vector.broadcast %73 : vector<8x1xf32> to vector<8x128xf32>
    %77 = arith.mulf %76, %71 : vector<8x128xf32>
    %78 = arith.addf %75, %77 : vector<8x128xf32>
    %c0_62 = arith.constant 0 : index
    %c896_63 = arith.constant 896 : index
    %79 = vector.load %arg4[%c0_62, %c896_63] : memref<8x2048xf32, #tpu.memory_space<vmem>>, vector<8x128xf32>
    tpu.vector_store %arg4[%c0_62, %c896_63], %78 {strides = array<i32>} : memref<8x2048xf32, #tpu.memory_space<vmem>>, vector<8x128xf32>,
    %c0_64 = arith.constant 0 : index
    %c1024_65 = arith.constant 1024 : index
    %80 = vector.load %arg3[%c0_64, %c1024_65] : memref<8x2048xf32, #tpu.memory_space<vmem>>, vector<8x128xf32>
    %c0_66 = arith.constant 0 : index
    %c512_67 = arith.constant 512 : index
    %81 = vector.load %arg3[%c0_66, %c512_67] : memref<8x2048xf32, #tpu.memory_space<vmem>>, vector<8x128xf32>
    %c0_68 = arith.constant 0 : index
    %c8 = arith.constant 8 : index
    %82 = vector.load %arg1[%c0_68, %c8] : memref<8x16xf32, #tpu.memory_space<vmem>>, vector<8x1xf32>
    %c0_69 = arith.constant 0 : index
    %c8_70 = arith.constant 8 : index
    %83 = vector.load %arg2[%c0_69, %c8_70] : memref<8x16xf32, #tpu.memory_space<vmem>>, vector<8x1xf32>
    %84 = vector.broadcast %82 : vector<8x1xf32> to vector<8x128xf32>
    %85 = arith.mulf %84, %80 : vector<8x128xf32>
    %86 = vector.broadcast %83 : vector<8x1xf32> to vector<8x128xf32>
    %87 = arith.mulf %86, %81 : vector<8x128xf32>
    %88 = arith.addf %85, %87 : vector<8x128xf32>
    %c0_71 = arith.constant 0 : index
    %c1024_72 = arith.constant 1024 : index
    %89 = vector.load %arg4[%c0_71, %c1024_72] : memref<8x2048xf32, #tpu.memory_space<vmem>>, vector<8x128xf32>
    tpu.vector_store %arg4[%c0_71, %c1024_72], %88 {strides = array<i32>} : memref<8x2048xf32, #tpu.memory_space<vmem>>, vector<8x128xf32>,
    %c0_73 = arith.constant 0 : index
    %c1152 = arith.constant 1152 : index
    %90 = vector.load %arg3[%c0_73, %c1152] : memref<8x2048xf32, #tpu.memory_space<vmem>>, vector<8x128xf32>
    %c0_74 = arith.constant 0 : index
    %c1920 = arith.constant 1920 : index
    %91 = vector.load %arg3[%c0_74, %c1920] : memref<8x2048xf32, #tpu.memory_space<vmem>>, vector<8x128xf32>
    %c0_75 = arith.constant 0 : index
    %c9 = arith.constant 9 : index
    %92 = vector.load %arg1[%c0_75, %c9] : memref<8x16xf32, #tpu.memory_space<vmem>>, vector<8x1xf32>
    %c0_76 = arith.constant 0 : index
    %c9_77 = arith.constant 9 : index
    %93 = vector.load %arg2[%c0_76, %c9_77] : memref<8x16xf32, #tpu.memory_space<vmem>>, vector<8x1xf32>
    %94 = vector.broadcast %92 : vector<8x1xf32> to vector<8x128xf32>
    %95 = arith.mulf %94, %90 : vector<8x128xf32>
    %96 = vector.broadcast %93 : vector<8x1xf32> to vector<8x128xf32>
    %97 = arith.mulf %96, %91 : vector<8x128xf32>
    %98 = arith.addf %95, %97 : vector<8x128xf32>
    %c0_78 = arith.constant 0 : index
    %c1152_79 = arith.constant 1152 : index
    %99 = vector.load %arg4[%c0_78, %c1152_79] : memref<8x2048xf32, #tpu.memory_space<vmem>>, vector<8x128xf32>
    tpu.vector_store %arg4[%c0_78, %c1152_79], %98 {strides = array<i32>} : memref<8x2048xf32, #tpu.memory_space<vmem>>, vector<8x128xf32>,
    %c0_80 = arith.constant 0 : index
    %c1280 = arith.constant 1280 : index
    %100 = vector.load %arg3[%c0_80, %c1280] : memref<8x2048xf32, #tpu.memory_space<vmem>>, vector<8x128xf32>
    %c0_81 = arith.constant 0 : index
    %c1792 = arith.constant 1792 : index
    %101 = vector.load %arg3[%c0_81, %c1792] : memref<8x2048xf32, #tpu.memory_space<vmem>>, vector<8x128xf32>
    %c0_82 = arith.constant 0 : index
    %c10 = arith.constant 10 : index
    %102 = vector.load %arg1[%c0_82, %c10] : memref<8x16xf32, #tpu.memory_space<vmem>>, vector<8x1xf32>
    %c0_83 = arith.constant 0 : index
    %c10_84 = arith.constant 10 : index
    %103 = vector.load %arg2[%c0_83, %c10_84] : memref<8x16xf32, #tpu.memory_space<vmem>>, vector<8x1xf32>
    %104 = vector.broadcast %102 : vector<8x1xf32> to vector<8x128xf32>
    %105 = arith.mulf %104, %100 : vector<8x128xf32>
    %106 = vector.broadcast %103 : vector<8x1xf32> to vector<8x128xf32>
    %107 = arith.mulf %106, %101 : vector<8x128xf32>
    %108 = arith.addf %105, %107 : vector<8x128xf32>
    %c0_85 = arith.constant 0 : index
    %c1280_86 = arith.constant 1280 : index
    %109 = vector.load %arg4[%c0_85, %c1280_86] : memref<8x2048xf32, #tpu.memory_space<vmem>>, vector<8x128xf32>
    tpu.vector_store %arg4[%c0_85, %c1280_86], %108 {strides = array<i32>} : memref<8x2048xf32, #tpu.memory_space<vmem>>, vector<8x128xf32>,
    %c0_87 = arith.constant 0 : index
    %c1408 = arith.constant 1408 : index
    %110 = vector.load %arg3[%c0_87, %c1408] : memref<8x2048xf32, #tpu.memory_space<vmem>>, vector<8x128xf32>
    %c0_88 = arith.constant 0 : index
    %c1664 = arith.constant 1664 : index
    %111 = vector.load %arg3[%c0_88, %c1664] : memref<8x2048xf32, #tpu.memory_space<vmem>>, vector<8x128xf32>
    %c0_89 = arith.constant 0 : index
    %c11 = arith.constant 11 : index
    %112 = vector.load %arg1[%c0_89, %c11] : memref<8x16xf32, #tpu.memory_space<vmem>>, vector<8x1xf32>
    %c0_90 = arith.constant 0 : index
    %c11_91 = arith.constant 11 : index
    %113 = vector.load %arg2[%c0_90, %c11_91] : memref<8x16xf32, #tpu.memory_space<vmem>>, vector<8x1xf32>
    %114 = vector.broadcast %112 : vector<8x1xf32> to vector<8x128xf32>
    %115 = arith.mulf %114, %110 : vector<8x128xf32>
    %116 = vector.broadcast %113 : vector<8x1xf32> to vector<8x128xf32>
    %117 = arith.mulf %116, %111 : vector<8x128xf32>
    %118 = arith.addf %115, %117 : vector<8x128xf32>
    %c0_92 = arith.constant 0 : index
    %c1408_93 = arith.constant 1408 : index
    %119 = vector.load %arg4[%c0_92, %c1408_93] : memref<8x2048xf32, #tpu.memory_space<vmem>>, vector<8x128xf32>
    tpu.vector_store %arg4[%c0_92, %c1408_93], %118 {strides = array<i32>} : memref<8x2048xf32, #tpu.memory_space<vmem>>, vector<8x128xf32>,
    %c0_94 = arith.constant 0 : index
    %c1536 = arith.constant 1536 : index
    %120 = vector.load %arg3[%c0_94, %c1536] : memref<8x2048xf32, #tpu.memory_space<vmem>>, vector<8x128xf32>
    %c0_95 = arith.constant 0 : index
    %c1536_96 = arith.constant 1536 : index
    %121 = vector.load %arg3[%c0_95, %c1536_96] : memref<8x2048xf32, #tpu.memory_space<vmem>>, vector<8x128xf32>
    %c0_97 = arith.constant 0 : index
    %c12 = arith.constant 12 : index
    %122 = vector.load %arg1[%c0_97, %c12] : memref<8x16xf32, #tpu.memory_space<vmem>>, vector<8x1xf32>
    %c0_98 = arith.constant 0 : index
    %c12_99 = arith.constant 12 : index
    %123 = vector.load %arg2[%c0_98, %c12_99] : memref<8x16xf32, #tpu.memory_space<vmem>>, vector<8x1xf32>
    %124 = vector.broadcast %122 : vector<8x1xf32> to vector<8x128xf32>
    %125 = arith.mulf %124, %120 : vector<8x128xf32>
    %126 = vector.broadcast %123 : vector<8x1xf32> to vector<8x128xf32>
    %127 = arith.mulf %126, %121 : vector<8x128xf32>
    %128 = arith.addf %125, %127 : vector<8x128xf32>
    %c0_100 = arith.constant 0 : index
    %c1536_101 = arith.constant 1536 : index
    %129 = vector.load %arg4[%c0_100, %c1536_101] : memref<8x2048xf32, #tpu.memory_space<vmem>>, vector<8x128xf32>
    tpu.vector_store %arg4[%c0_100, %c1536_101], %128 {strides = array<i32>} : memref<8x2048xf32, #tpu.memory_space<vmem>>, vector<8x128xf32>,
    %c0_102 = arith.constant 0 : index
    %c1664_103 = arith.constant 1664 : index
    %130 = vector.load %arg3[%c0_102, %c1664_103] : memref<8x2048xf32, #tpu.memory_space<vmem>>, vector<8x128xf32>
    %c0_104 = arith.constant 0 : index
    %c1408_105 = arith.constant 1408 : index
    %131 = vector.load %arg3[%c0_104, %c1408_105] : memref<8x2048xf32, #tpu.memory_space<vmem>>, vector<8x128xf32>
    %c0_106 = arith.constant 0 : index
    %c13 = arith.constant 13 : index
    %132 = vector.load %arg1[%c0_106, %c13] : memref<8x16xf32, #tpu.memory_space<vmem>>, vector<8x1xf32>
    %c0_107 = arith.constant 0 : index
    %c13_108 = arith.constant 13 : index
    %133 = vector.load %arg2[%c0_107, %c13_108] : memref<8x16xf32, #tpu.memory_space<vmem>>, vector<8x1xf32>
    %134 = vector.broadcast %132 : vector<8x1xf32> to vector<8x128xf32>
    %135 = arith.mulf %134, %130 : vector<8x128xf32>
    %136 = vector.broadcast %133 : vector<8x1xf32> to vector<8x128xf32>
    %137 = arith.mulf %136, %131 : vector<8x128xf32>
    %138 = arith.addf %135, %137 : vector<8x128xf32>
    %c0_109 = arith.constant 0 : index
    %c1664_110 = arith.constant 1664 : index
    %139 = vector.load %arg4[%c0_109, %c1664_110] : memref<8x2048xf32, #tpu.memory_space<vmem>>, vector<8x128xf32>
    tpu.vector_store %arg4[%c0_109, %c1664_110], %138 {strides = array<i32>} : memref<8x2048xf32, #tpu.memory_space<vmem>>, vector<8x128xf32>,
    %c0_111 = arith.constant 0 : index
    %c1792_112 = arith.constant 1792 : index
    %140 = vector.load %arg3[%c0_111, %c1792_112] : memref<8x2048xf32, #tpu.memory_space<vmem>>, vector<8x128xf32>
    %c0_113 = arith.constant 0 : index
    %c1280_114 = arith.constant 1280 : index
    %141 = vector.load %arg3[%c0_113, %c1280_114] : memref<8x2048xf32, #tpu.memory_space<vmem>>, vector<8x128xf32>
    %c0_115 = arith.constant 0 : index
    %c14 = arith.constant 14 : index
    %142 = vector.load %arg1[%c0_115, %c14] : memref<8x16xf32, #tpu.memory_space<vmem>>, vector<8x1xf32>
    %c0_116 = arith.constant 0 : index
    %c14_117 = arith.constant 14 : index
    %143 = vector.load %arg2[%c0_116, %c14_117] : memref<8x16xf32, #tpu.memory_space<vmem>>, vector<8x1xf32>
    %144 = vector.broadcast %142 : vector<8x1xf32> to vector<8x128xf32>
    %145 = arith.mulf %144, %140 : vector<8x128xf32>
    %146 = vector.broadcast %143 : vector<8x1xf32> to vector<8x128xf32>
    %147 = arith.mulf %146, %141 : vector<8x128xf32>
    %148 = arith.addf %145, %147 : vector<8x128xf32>
    %c0_118 = arith.constant 0 : index
    %c1792_119 = arith.constant 1792 : index
    %149 = vector.load %arg4[%c0_118, %c1792_119] : memref<8x2048xf32, #tpu.memory_space<vmem>>, vector<8x128xf32>
    tpu.vector_store %arg4[%c0_118, %c1792_119], %148 {strides = array<i32>} : memref<8x2048xf32, #tpu.memory_space<vmem>>, vector<8x128xf32>,
    %c0_120 = arith.constant 0 : index
    %c1920_121 = arith.constant 1920 : index
    %150 = vector.load %arg3[%c0_120, %c1920_121] : memref<8x2048xf32, #tpu.memory_space<vmem>>, vector<8x128xf32>
    %c0_122 = arith.constant 0 : index
    %c1152_123 = arith.constant 1152 : index
    %151 = vector.load %arg3[%c0_122, %c1152_123] : memref<8x2048xf32, #tpu.memory_space<vmem>>, vector<8x128xf32>
    %c0_124 = arith.constant 0 : index
    %c15 = arith.constant 15 : index
    %152 = vector.load %arg1[%c0_124, %c15] : memref<8x16xf32, #tpu.memory_space<vmem>>, vector<8x1xf32>
    %c0_125 = arith.constant 0 : index
    %c15_126 = arith.constant 15 : index
    %153 = vector.load %arg2[%c0_125, %c15_126] : memref<8x16xf32, #tpu.memory_space<vmem>>, vector<8x1xf32>
    %154 = vector.broadcast %152 : vector<8x1xf32> to vector<8x128xf32>
    %155 = arith.mulf %154, %150 : vector<8x128xf32>
    %156 = vector.broadcast %153 : vector<8x1xf32> to vector<8x128xf32>
    %157 = arith.mulf %156, %151 : vector<8x128xf32>
    %158 = arith.addf %155, %157 : vector<8x128xf32>
    %c0_127 = arith.constant 0 : index
    %c1920_128 = arith.constant 1920 : index
    %159 = vector.load %arg4[%c0_127, %c1920_128] : memref<8x2048xf32, #tpu.memory_space<vmem>>, vector<8x128xf32>
    tpu.vector_store %arg4[%c0_127, %c1920_128], %158 {strides = array<i32>} : memref<8x2048xf32, #tpu.memory_space<vmem>>, vector<8x128xf32>,
    return
  }
  func.func @transform_0(%arg0: i32) -> (i32, i32) {
    %c0_i32 = arith.constant 0 : i32
    %c0_i32_0 = arith.constant 0 : i32
    return %arg0, %c0_i32 : i32, i32
  }
  func.func @transform_1(%arg0: i32) -> (i32, i32) {
    %c0_i32 = arith.constant 0 : i32
    %c0_i32_0 = arith.constant 0 : i32
    return %arg0, %c0_i32 : i32, i32
  }
  func.func @transform_2(%arg0: i32) -> (i32, i32) {
    %c0_i32 = arith.constant 0 : i32
    %c0_i32_0 = arith.constant 0 : i32
    return %arg0, %c0_i32 : i32, i32
  }
  func.func @transform_3(%arg0: i32) -> (i32, i32) {
    %c0_i32 = arith.constant 0 : i32
    %c0_i32_0 = arith.constant 0 : i32
    return %arg0, %c0_i32 : i32, i32
  }
}

</mosaic_0001>

<bundles_post_ra>
// kernel: tpu_custom_call.1
= control target key start
LH: loop header
LB: loop body
LE: loop exit
PB: predicated region body
PF: predicated region fallthrough
CT: control target
= control target key end

     0   :  { %s1259_s0 = inlined_call_operand.hbm [shape: f32[16,16], index: 0, kind: input, shape index: {}]   ;;  %s1260_s1 = inlined_call_operand.hbm [shape: f32[16,16], index: 1, kind: input, shape index: {}]   ;;  %s1261_s2 = inlined_call_operand.hbm [shape: f32[16,2048], index: 2, kind: input, shape index: {}]   ;;  %s1262_s3 = inlined_call_operand.hbm [shape: f32[16,2048], index: 3, kind: output, shape index: {}]  }
   0x1   :  { %1266 = sst [smem:[#allocation13_spill]] %s1259_s0 }
   0x2   :  { %1267 = sst [smem:[#allocation14_spill]] %s1260_s1 }
   0x3   :  { %8 = vsyncpa [#allocation3], 0 }
   0x4   :  { %10 = vsyncpa [#allocation3 + $0x1], 0 }
   0x5   :  { %11 = vsyncpa [#allocation6], 0 }
   0x6   :  { %13 = vsyncpa [#allocation6 + $0x1], 0 }
   0x7   :  { %14 = vsyncpa [#allocation4], 0 }
   0x8   :  { %16 = vsyncpa [#allocation4 + $0x1], 0  ;;  %s984_s12 = smov 0   ;;  %s986_s13 = smov 0  }
   0x9   :  { %s988_s14 = smov 0   ;;  %s990_s15 = smov 0  }
   0xa LB: > { %s1005_s16 = sadd.s32 4294967295, %s942_s15   ;;  %s670_s17 = sadd.s32 4294967294, %s942_s15   ;;  %s942_s15 = sphi %s990_s15, %s1288_s15   ;;  %s938_s14 = sphi %s988_s14, %s1287_s14   ;;  %s934_s13 = sphi %s986_s13, %s1286_s13   ;;  %s930_s12 = sphi %s984_s12, %s1285_s12  }
   0xb   : > { %s1009_s18 = sadd.s32 1, %s942_s15   ;;  %s29_s19 = sadd.s32 1, %s938_s14 }
   0xc   : > { %s26_s20 = ssub.s32 %s942_s15, %s1009_s18  ;;  %p36_p0 = scmp.ne.s32.totalorder %s938_s14, %s934_s13 }
   0xd   : > { %p27_p1 = scmp.eq.s32.totalorder %s26_s20, 0  ;;  %p37_p2 = scmp.eq.s32.totalorder %s942_s15, 0 }
   0xe   : > { %p42_p3 = scmp.ne.s32.totalorder %s934_s13, %s930_s12  ;;  %p43_p4 = scmp.eq.s32.totalorder %s1005_s16, 0 }
   0xf   : > { %s1021_s21 = scalar_select %p27_p1, %s938_s14, %s29_s19  }
  0x10   : > { %p38_p5 = por %p37_p2, %p36_p0  ;;  %p1023_p6 = por %p43_p4, %p42_p3 }
  0x11   : > { %1268 = sst [smem:[#allocation12_spill]] %s1021_s21  ;;  %p118_p7 = scmp.eq.s32.totalorder %s1005_s16, 1 }
  0x12   : > { %s1269_s22 = scalar_select %p1023_p6, 1, 0 }
  0x13   : > { %p124_p8 = scmp.eq.s32.totalorder %s670_s17, 1  ;;  %p714_p10 = scmp.lt.s32.totalorder %s942_s15, 2 }
  0x14   : > { %p1030_p11 = por %p118_p7, %p36_p0  ;;  %s1039_s25 = sand.u32 1, %s938_s14  }
  0x15   : > { %p1034_p12 = por %p124_p8, %p42_p3  ;;  %s674_s26 = sshll.u32 %s942_s15, 7 }
  0x16   : > { %s1270_s23 = scalar_select %p1030_p11, 1, 0 }
  0x17   : > { %s1271_s24 = scalar_select %p1034_p12, 1, 0 }
  0x18   : > { %s1263_s27 = sshll.u32 %s1039_s25, 3  ;;  %p1043_p13 = pnand %p714_p10, %p38_p5 }
  0x19   : > { %s162_s29 = sand.u32 1, %s942_s15   ;;  %s1273_s1 = sld [smem:[#allocation14_spill]] }
  0x1a   : > { %s166_s6 = scalar_lea.vmem [#allocation5], %s1263_s27  ;;  %s1058_s8 = scalar_lea.sflag [#allocation6], %s162_s29 }
  0x1b   : > { %s173_s7 = sshll.u32 %s166_s6, 4  ;;  %p1064_p2 = pneg %p1043_p13  ;;  %s174_s7 = int_to_ptr.vmem [resolvable:$true] %s173_s7 }
  0x1f   : > { %s1053_s5 = scalar_lea.hbm %s1273_s1, %s674_s26  ;;  %s795_s19 = scalar_lea.hbm %s1273_s1, 256 }
  0x20   : > { %s790_s9 = scalar_lea.hbm %s1053_s5, 128  ;;  %p796_p5 = scmp.lt.s32.totalorder %s1053_s5, %s1273_s1 }
  0x21   : > { %p791_p1 = scmp.ne.s32.totalorder %s1053_s5, %s790_s9  ;;  %p797_p7 = scmp.lt.s32.totalorder %s795_s19, %s790_s9 }
  0x23   : > { %p793_p3 = pnand %p1064_p2, %p791_p1  ;;  %p798_p8 = por %p797_p7, %p796_p5 }
  0x25   : > { %p794_p4 = pneg %p793_p3 }
  0x27   : > { %p799_p10 = pnand %p798_p8, %p794_p4 }
  0x29   : > { %802 = shalt.err (!%p799_p10)
}
  0x2a   : > { %s803_s29 = scalar_lea.vmem %s174_s7, 128  ;;  %s944_s4 = smov [#allocation5]  }
  0x2b   : > { %p804_p9 = scmp.ne.s32.totalorder %s174_s7, %s803_s29  ;;  %s808_s6 = sshll.u32 %s944_s4, 4  ;;  %s809_s6 = int_to_ptr.vmem [resolvable:$false] %s808_s6 }
  0x2c   : > { %s810_s27 = scalar_lea.vmem %s809_s6, 256  ;;  %p811_p1 = scmp.lt.s32.totalorder %s174_s7, %s809_s6 }
  0x2d   : > { %p806_p0 = pnand %p804_p9, %p1064_p2  ;;  %p812_p3 = scmp.lt.s32.totalorder %s810_s27, %s803_s29 }
  0x2f   : > { %p807_p12 = pneg %p806_p0  ;;  %p813_p11 = por %p812_p3, %p811_p1 }
  0x31   : > { %p814_p6 = pnand %p813_p11, %p807_p12 }
  0x33   : > { %817 = shalt.err (!%p814_p6)
}
  0x34   : > { %706 = dma.hbm_to_vmem [thread:$0]  (!%p1043_p13), %s1053_s5, 128, %s174_s7, %s1058_s8  }
  0x35   : > { %p197_p9 = scmp.lt.s32.totalorder %s942_s15, 3  ;;  %s1275_s0 = sld [smem:[#allocation13_spill]] }
  0x36   : > { %p1276_p6 = scmp.ge.s32.totalorder %s942_s15, 1  ;;  %s1278_s19 = sshll.u32 %s1039_s25, 3 }
  0x37   : > { %s148_s20 = scalar_lea.vmem [#allocation2], %s1278_s19  ;;  %s677_s5 = sshll.u32 %s1039_s25, 7 }
  0x38   : > { %p1093_p11 = pnand %p1276_p6, %p197_p9  ;;  %s155_s30 = sshll.u32 %s148_s20, 4  ;;  %s156_s30 = int_to_ptr.vmem [resolvable:$true] %s155_s30 }
  0x39   : > { %s145_s7 = scalar_lea.sflag [#allocation3], %s1039_s25 }
  0x3a   : > { %s1277_s17 = scalar_select %p1093_p11, 1, 0 }
  0x3b   : > { %s1089_s27 = scalar_lea.hbm %s1275_s0, %s674_s26  ;;  %s823_s6 = scalar_lea.hbm %s1275_s0, 256 }
  0x3c   : > { %s818_s29 = scalar_lea.hbm %s1089_s27, 128  ;;  %p824_p5 = scmp.lt.s32.totalorder %s1089_s27, %s1275_s0 }
  0x3d   : > { %p819_p12 = scmp.ne.s32.totalorder %s1089_s27, %s818_s29  ;;  %p825_p7 = scmp.lt.s32.totalorder %s823_s6, %s818_s29 }
  0x3f   : > { %p821_p0 = pnand %p819_p12, %p1064_p2  ;;  %p826_p8 = por %p825_p7, %p824_p5 }
  0x41   : > { %p822_p4 = pneg %p821_p0 }
  0x43   : > { %p827_p10 = pnand %p826_p8, %p822_p4 }
  0x45   : > { %830 = shalt.err (!%p827_p10)
}
  0x46   : > { %s831_s19 = scalar_lea.vmem %s156_s30, 128  ;;  %s945_s25 = smov [#allocation2]  }
  0x47   : > { %p832_p1 = scmp.ne.s32.totalorder %s156_s30, %s831_s19  ;;  %s836_s20 = sshll.u32 %s945_s25, 4  ;;  %s837_s20 = int_to_ptr.vmem [resolvable:$false] %s836_s20 }
  0x48   : > { %s838_s1 = scalar_lea.vmem %s837_s20, 256  ;;  %p839_p6 = scmp.lt.s32.totalorder %s156_s30, %s837_s20 }
  0x49   : > { %p834_p3 = pnand %p832_p1, %p1064_p2  ;;  %p840_p12 = scmp.lt.s32.totalorder %s838_s1, %s831_s19 }
  0x4b   : > { %p835_p9 = pneg %p834_p3  ;;  %p841_p0 = por %p840_p12, %p839_p6 }
  0x4d   : > { %p842_p11 = pnand %p841_p0, %p835_p9 }
  0x4f   : > { %845 = shalt.err (!%p842_p11)
}
  0x50   : > { %703 = dma.hbm_to_vmem [thread:$0]  (!%p1043_p13), %s1089_s27, 128, %s156_s30, %s145_s7  }
  0x51   : > { %s690_s29 = sshll.u32 %s942_s15, 11  ;;  %s184_s9 = scalar_lea.vmem [#allocation7], %s677_s5 }
  0x52   : > { %s190_s6 = scalar_lea.hbm %s1261_s2, %s690_s29  ;;  %s192_s11 = sshll.u32 %s184_s9, 4  ;;  %s193_s11 = int_to_ptr.vmem [resolvable:$true] %s192_s11 }
  0x53   : > { %s846_s25 = scalar_lea.hbm %s190_s6, 2048  ;;  %s851_s20 = scalar_lea.hbm %s1261_s2, 4096 }
  0x54   : > { %p847_p4 = scmp.ne.s32.totalorder %s190_s6, %s846_s25  ;;  %p852_p11 = scmp.lt.s32.totalorder %s190_s6, %s1261_s2 }
  0x55   : > { %p853_p8 = scmp.lt.s32.totalorder %s851_s20, %s846_s25 }
  0x56   : > { %p849_p5 = pnand %p847_p4, %p1064_p2 }
  0x57   : > { %p854_p10 = por %p853_p8, %p852_p11 }
  0x58   : > { %p850_p7 = pneg %p849_p5 }
  0x5a   : > { %p855_p1 = pnand %p854_p10, %p850_p7 }
  0x5c   : > { %858 = shalt.err (!%p855_p1)
}
  0x5d   : > { %s859_s27 = scalar_lea.vmem %s193_s11, 2048  ;;  %s946_s30 = smov [#allocation7]  }
  0x5e   : > { %p860_p3 = scmp.ne.s32.totalorder %s193_s11, %s859_s27  ;;  %s864_s5 = sshll.u32 %s946_s30, 4  ;;  %s865_s5 = int_to_ptr.vmem [resolvable:$false] %s864_s5 }
  0x5f   : > { %s866_s7 = scalar_lea.vmem %s865_s5, 4096  ;;  %p867_p12 = scmp.lt.s32.totalorder %s193_s11, %s865_s5 }
  0x60   : > { %p862_p9 = pnand %p860_p3, %p1064_p2  ;;  %p868_p0 = scmp.lt.s32.totalorder %s866_s7, %s859_s27 }
  0x62   : > { %p863_p6 = pneg %p862_p9  ;;  %p869_p4 = por %p868_p0, %p867_p12 }
  0x64   : > { %p870_p5 = pnand %p869_p4, %p863_p6 }
  0x66   : > { %873 = shalt.err (!%p870_p5)
}
  0x67   : > { %709 = dma.hbm_to_vmem [thread:$0]  (!%p1043_p13), %s190_s6, 2048, %s193_s11, %s1058_s8  }
  0x68   : > { %p1279_p7 = scmp.ne.s32.totalorder %s1277_s17, 0 }
  0x69   : > { %s1137_s0 = sand.u32 (!%p1279_p7), 1, %s934_s13   ;;  %p1280_p2 = scmp.ne.s32.totalorder (!%p1279_p7), %s1269_s22, 0 }
  0x6a   : > { %201 = sbr.rel (%p1279_p7) target bundleno = 348 (0x15c), region = 32  ;;  %s681_s21 = sshll.u32 (!%p1279_p7), %s1137_s0, 3 }
  0x6b   : > { %s204_s10 = scalar_lea.sflag (!%p1279_p7), [#allocation3], %s1137_s0  ;;  %s207_s29 = scalar_lea.vmem (!%p1279_p7), [#allocation2], %s681_s21 }
  0x6f   : > { %917 = dma.done.wait (%p1280_p2), %s204_s10, 128  }
  0x70   : > { %919 = vsyncadd (%p1280_p2), %s204_s10, 4294967168  ;;  %s212_s28 = sand.u32 1, %s1005_s16   ;;  %s216_s17 = scalar_lea.vmem [#allocation5], %s681_s21 }
  0x71   : > { %s213_s8 = scalar_lea.sflag [#allocation6], %s212_s28 }
  0x72   : > { %921 = dma.done.wait (%p1280_p2), %s213_s8, 2176  }
  0x73   : > { %923 = vsyncadd (%p1280_p2), %s213_s8, 4294965120  ;;  %v947_v0 = vmov 1   ;;  %v948_v1 = vmov 0   ;;  %v1150_v2 = vld [vmem:[%s207_s29] sm:$0xff]  ;;  %v1154_v3 = vld [vmem:[%s216_s17] sm:$0xff]  ;;  %v949_v4 = vmov 2  }
  0x74   : > { %765 = vset.pattern.permute.xlu1 %v947_v0  ;;  %764 = vset.pattern.permute.xlu0 %v948_v1  ;;  %v950_v5 = vmov 3   ;;  %v951_v6 = vmov 4   ;;  %v952_v7 = vmov 5   ;;  %v953_v8 = vmov 6   ;;  %s683_s22 = sshll.u32 %s1137_s0, 7  ;;  %s691_s6 = sshll.u32 %s1005_s16, 11 }
  0x75   : > { %281 = vperm.xlu1 %765, %v1150_v2   ;;  %263 = vperm.xlu0 %764, %v1150_v2   ;;  %v954_v9 = vmov 8   ;;  %v955_v10 = vmov 9   ;;  %v956_v11 = vmov 7   ;;  %v957_v12 = vmov 11   ;;  %s1187_s26 = scalar_lea.vmem [#allocation7], %s683_s22  ;;  %s1193_s4 = scalar_lea.vmem [#allocation8], %s683_s22 }
  0x76   : > { %v958_v13 = vmov 12   ;;  %v959_v14 = vmov 14   ;;  %v960_v15 = vmov 15   ;;  %v961_v16 = vmov 10   ;;  %v258_v20 = vld [vmem:[%s1187_s26] sm:$0xff]  ;;  %v275_v21 = vld [vmem:[%s1187_s26 + $0x8] sm:$0xff]  ;;  %s555_s1 = scalar_lea.hbm %s1262_s3, %s691_s6 }
  0x77   : > { %v962_v17 = vmov 13   ;;  %v276_v22 = vld [vmem:[%s1187_s26 + $0x18] sm:$0xff]  ;;  %v293_v31 = vld [vmem:[%s1187_s26 + $0x10] sm:$0xff]  ;;  %v328_v43 = vld [vmem:[%s1187_s26 + $0x20] sm:$0xff]  ;;  %s557_s9 = sshll.u32 %s1193_s4, 4  ;;  %s543_s19 = scalar_lea.sflag [#allocation4], %s1137_s0  ;;  %s558_s9 = int_to_ptr.vmem [resolvable:$true] %s557_s9 }
  0x78   : > { %v329_v44 = vld [vmem:[%s1187_s26 + $0x40] sm:$0xff]  ;;  %v346_v49 = vld [vmem:[%s1187_s26 + $0x28] sm:$0xff]  ;;  %v347_v51 = vld [vmem:[%s1187_s26 + $0x38] sm:$0xff]  ;;  %s874_s20 = scalar_lea.vmem %s558_s9, 2048  ;;  %p1281_p11 = scmp.ne.s32.totalorder %s1270_s23, 0 }
  0x79   : > { %287 = vperm.xlu1 %765, %v1154_v3   ;;  %269 = vperm.xlu0 %764, %v1154_v3   ;;  %v364_v55 = vld [vmem:[%s1187_s26 + $0x30] sm:$0xff]  ;;  %p875_p13 = scmp.ne.s32.totalorder %s558_s9, %s874_s20  ;;  %s963_s27 = smov [#allocation8]  }
  0x7a   : > { %s878_s30 = sshll.u32 %s963_s27, 4  ;;  %s879_s30 = int_to_ptr.vmem [resolvable:$false] %s878_s30 }
  0x7b   : > { %p876_p8 = pnand %p875_p13, %p1281_p11  ;;  %s880_s5 = scalar_lea.vmem %s879_s30, 4096 }
  0x7c   : > { %p881_p1 = scmp.lt.s32.totalorder %s558_s9, %s879_s30  ;;  %p882_p3 = scmp.lt.s32.totalorder %s880_s5, %s874_s20 }
  0x7d   : > { %767 = vset.pattern.permute.xlu1 %v949_v4  ;;  %766 = vset.pattern.permute.xlu0 %v949_v4  ;;  %p877_p10 = pneg %p876_p8 }
  0x7e   : > { %304 = vperm.xlu1 %767, %v1154_v3   ;;  %298 = vperm.xlu0 %766, %v1150_v2   ;;  %p883_p9 = por %p882_p3, %p881_p1 }
  0x80   : > { %p884_p6 = pnand %p883_p9, %p877_p10 }
  0x82   : > { %768 = vset.pattern.permute.xlu1 %v950_v5  ;;  %769 = vset.pattern.permute.xlu0 %v950_v5 }
  0x83   : > { %316 = vperm.xlu1 %768, %v1150_v2   ;;  %322 = vperm.xlu0 %769, %v1154_v3  }
  0x87   : > { %770 = vset.pattern.permute.xlu1 %v951_v6  ;;  %771 = vset.pattern.permute.xlu0 %v952_v7 }
  0x88   : > { %334 = vperm.xlu1 %770, %v1150_v2   ;;  %352 = vperm.xlu0 %771, %v1150_v2  }
  0x8c   : > { %340 = vperm.xlu1 %770, %v1154_v3   ;;  %774 = vset.pattern.permute.xlu0 %v953_v8 }
  0x8d   : > { %375 = vperm.xlu0 %774, %v1154_v3  }
  0x90   : > { %772 = vset.pattern.permute.xlu1 %v952_v7  ;;  %v418_v7 = vld [vmem:[%s1187_s26 + $0x78] sm:$0xff] }
  0x91   : > { %358 = vperm.xlu1 %772, %v1154_v3   ;;  %776 = vset.pattern.permute.xlu0 %v954_v9 }
  0x92   : > { %405 = vperm.xlu0 %776, %v1150_v2  }
  0x95   : > { %773 = vset.pattern.permute.xlu1 %v953_v8 }
  0x96   : > { %369 = vperm.xlu1 %773, %v1150_v2   ;;  %779 = vset.pattern.permute.xlu0 %v955_v10 }
  0x97   : > { %429 = vperm.xlu0 %779, %v1154_v3  }
  0x9a   : > { %775 = vset.pattern.permute.xlu1 %v956_v11 }
  0x9b   : > { %387 = vperm.xlu1 %775, %v1150_v2   ;;  %781 = vset.pattern.permute.xlu0 %v957_v12 }
  0x9c   : > { %459 = vperm.xlu0 %781, %v1150_v2  }
  0x9f   : > { %393 = vperm.xlu1 %775, %v1154_v3  }
  0xa0   : > { %784 = vset.pattern.permute.xlu0 %v958_v13 }
  0xa1   : > { %482 = vperm.xlu0 %784, %v1154_v3  }
  0xa3   : > { %777 = vset.pattern.permute.xlu1 %v954_v9 }
  0xa4   : > { %411 = vperm.xlu1 %777, %v1154_v3  }
  0xa5   : > { %786 = vset.pattern.permute.xlu0 %v959_v14 }
  0xa6   : > { %512 = vperm.xlu0 %786, %v1150_v2  }
  0xa8   : > { %778 = vset.pattern.permute.xlu1 %v955_v10  ;;  %v417_v10 = vld [vmem:[%s1187_s26 + $0x48] sm:$0xff] }
  0xa9   : > { %423 = vperm.xlu1 %778, %v1150_v2  }
  0xaa   : > { %789 = vset.pattern.permute.xlu0 %v960_v15 }
  0xab   : > { %536 = vperm.xlu0 %789, %v1154_v3  }
  0xad   : > { %780 = vset.pattern.permute.xlu1 %v961_v16  ;;  %v435_v16 = vld [vmem:[%s1187_s26 + $0x50] sm:$0xff] }
  0xae   : > { %441 = vperm.xlu1 %780, %v1150_v2  }
  0xb2   : > { %447 = vperm.xlu1 %780, %v1154_v3  }
  0xb6   : > { %782 = vset.pattern.permute.xlu1 %v957_v12 }
  0xb7   : > { %465 = vperm.xlu1 %782, %v1154_v3  }
  0xbb   : > { %783 = vset.pattern.permute.xlu1 %v958_v13 }
  0xbc   : > { %476 = vperm.xlu1 %783, %v1150_v2  }
  0xc0   : > { %785 = vset.pattern.permute.xlu1 %v962_v17  ;;  %v436_v17 = vld [vmem:[%s1187_s26 + $0x70] sm:$0xff] }
  0xc1   : > { %494 = vperm.xlu1 %785, %v1150_v2  }
  0xc5   : > { %500 = vperm.xlu1 %785, %v1154_v3  }
  0xc9   : > { %787 = vset.pattern.permute.xlu1 %v959_v14 }
  0xca   : > { %518 = vperm.xlu1 %787, %v1154_v3  }
  0xce   : > { %788 = vset.pattern.permute.xlu1 %v960_v15 }
  0xcf   : > { %530 = vperm.xlu1 %788, %v1150_v2  }
  0xf0   : > { %v282_v18 = vpop.permute.xlu1 %281  ;;  %v264_v19 = vpop.permute.xlu0 %263 }
  0xf1   : > { %v266_v23 = vmul.f32 %v264_v19, %v258_v20  ;;  %v284_v26 = vmul.f32 %v282_v18, %v275_v21 }
  0xf4   : > { %v288_v24 = vpop.permute.xlu1 %287  ;;  %v270_v25 = vpop.permute.xlu0 %269 }
  0xf5   : > { %v290_v27 = vmul.f32 %v288_v24, %v276_v22  ;;  %v272_v28 = vmul.f32 %v270_v25, %v258_v20  ;;  %v454_v24 = vld [vmem:[%s1187_s26 + $0x68] sm:$0xff] }
  0xf7   : > { %v291_v29 = vadd.f32 %v290_v27, %v284_v26  ;;  %v273_v30 = vadd.f32 %v272_v28, %v266_v23  ;;  %v471_v28 = vld [vmem:[%s1187_s26 + $0x60] sm:$0xff] }
  0xf9   : > { %292 = vst [vmem:[%s1193_s4 + $0x8] sm:$0xff] %v291_v29  ;;  %274 = vst [vmem:[%s1193_s4] sm:$0xff] %v273_v30  ;;  %v305_v32 = vpop.permute.xlu1 %304  ;;  %v299_v33 = vpop.permute.xlu0 %298 }
  0xfa   : > { %v307_v34 = vmul.f32 %v305_v32, %v293_v31  ;;  %v301_v35 = vmul.f32 %v299_v33, %v293_v31 }
  0xfc   : > { %v308_v36 = vadd.f32 %v307_v34, %v301_v35 }
  0xfe   : > { %309 = vst [vmem:[%s1193_s4 + $0x10] sm:$0xff] %v308_v36  ;;  %v317_v37 = vpop.permute.xlu1 %316  ;;  %v323_v38 = vpop.permute.xlu0 %322 }
  0xff   : > { %v319_v39 = vmul.f32 %v317_v37, %v276_v22  ;;  %v325_v40 = vmul.f32 %v323_v38, %v275_v21  ;;  %v453_v22 = vld [vmem:[%s1187_s26 + $0x58] sm:$0xff] }
 0x101   : > { %v326_v41 = vadd.f32 %v325_v40, %v319_v39 }
 0x103   : > { %327 = vst [vmem:[%s1193_s4 + $0x18] sm:$0xff] %v326_v41  ;;  %v335_v42 = vpop.permute.xlu1 %334  ;;  %v353_v46 = vpop.permute.xlu0 %352 }
 0x104   : > { %v337_v47 = vmul.f32 %v335_v42, %v328_v43  ;;  %v355_v52 = vmul.f32 %v353_v46, %v346_v49 }
 0x107   : > { %v341_v45 = vpop.permute.xlu1 %340 }
 0x108   : > { %v343_v48 = vmul.f32 %v341_v45, %v329_v44  ;;  %v376_v56 = vpop.permute.xlu0 %375 }
 0x109   : > { %v378_v58 = vmul.f32 %v376_v56, %v364_v55 }
 0x10a   : > { %v344_v50 = vadd.f32 %v343_v48, %v337_v47 }
 0x10c   : > { %345 = vst [vmem:[%s1193_s4 + $0x20] sm:$0xff] %v344_v50  ;;  %v359_v53 = vpop.permute.xlu1 %358 }
 0x10d   : > { %v361_v54 = vmul.f32 %v359_v53, %v347_v51  ;;  %v406_v0 = vpop.permute.xlu0 %405 }
 0x10e   : > { %v408_v4 = vmul.f32 %v406_v0, %v329_v44 }
 0x10f   : > { %v362_v57 = vadd.f32 %v361_v54, %v355_v52 }
 0x111   : > { %363 = vst [vmem:[%s1193_s4 + $0x28] sm:$0xff] %v362_v57  ;;  %v370_v59 = vpop.permute.xlu1 %369 }
 0x112   : > { %v372_v60 = vmul.f32 %v370_v59, %v364_v55  ;;  %v430_v8 = vpop.permute.xlu0 %429 }
 0x113   : > { %v432_v11 = vmul.f32 %v430_v8, %v418_v7 }
 0x114   : > { %v379_v61 = vadd.f32 %v378_v58, %v372_v60 }
 0x116   : > { %380 = vst [vmem:[%s1193_s4 + $0x30] sm:$0xff] %v379_v61  ;;  %v388_v62 = vpop.permute.xlu1 %387 }
 0x117   : > { %v390_v1 = vmul.f32 %v388_v62, %v347_v51  ;;  %v460_v19 = vpop.permute.xlu0 %459 }
 0x118   : > { %v462_v25 = vmul.f32 %v460_v19, %v453_v22 }
 0x11a   : > { %v394_v63 = vpop.permute.xlu1 %393 }
 0x11b   : > { %v396_v2 = vmul.f32 %v394_v63, %v346_v49 }
 0x11c   : > { %v483_v29 = vpop.permute.xlu0 %482 }
 0x11d   : > { %v397_v3 = vadd.f32 %v396_v2, %v390_v1  ;;  %v485_v31 = vmul.f32 %v483_v29, %v471_v28 }
 0x11f   : > { %398 = vst [vmem:[%s1193_s4 + $0x38] sm:$0xff] %v397_v3  ;;  %v412_v5 = vpop.permute.xlu1 %411 }
 0x120   : > { %v414_v6 = vmul.f32 %v412_v5, %v328_v43 }
 0x121   : > { %v513_v37 = vpop.permute.xlu0 %512 }
 0x122   : > { %v415_v9 = vadd.f32 %v414_v6, %v408_v4  ;;  %v515_v41 = vmul.f32 %v513_v37, %v436_v17 }
 0x124   : > { %416 = vst [vmem:[%s1193_s4 + $0x40] sm:$0xff] %v415_v9  ;;  %v424_v12 = vpop.permute.xlu1 %423 }
 0x125   : > { %v426_v13 = vmul.f32 %v424_v12, %v417_v10 }
 0x126   : > { %v537_v44 = vpop.permute.xlu0 %536 }
 0x127   : > { %v433_v14 = vadd.f32 %v432_v11, %v426_v13  ;;  %v539_v46 = vmul.f32 %v537_v44, %v417_v10 }
 0x129   : > { %434 = vst [vmem:[%s1193_s4 + $0x48] sm:$0xff] %v433_v14  ;;  %v442_v15 = vpop.permute.xlu1 %441 }
 0x12a   : > { %v444_v20 = vmul.f32 %v442_v15, %v435_v16 }
 0x12d   : > { %v448_v18 = vpop.permute.xlu1 %447 }
 0x12e   : > { %v450_v21 = vmul.f32 %v448_v18, %v436_v17 }
 0x130   : > { %v451_v23 = vadd.f32 %v450_v21, %v444_v20 }
 0x132   : > { %452 = vst [vmem:[%s1193_s4 + $0x50] sm:$0xff] %v451_v23  ;;  %v466_v26 = vpop.permute.xlu1 %465 }
 0x133   : > { %v468_v27 = vmul.f32 %v466_v26, %v454_v24 }
 0x135   : > { %v469_v30 = vadd.f32 %v468_v27, %v462_v25 }
 0x137   : > { %470 = vst [vmem:[%s1193_s4 + $0x58] sm:$0xff] %v469_v30  ;;  %v477_v32 = vpop.permute.xlu1 %476 }
 0x138   : > { %v479_v33 = vmul.f32 %v477_v32, %v471_v28 }
 0x13a   : > { %v486_v34 = vadd.f32 %v485_v31, %v479_v33 }
 0x13c   : > { %487 = vst [vmem:[%s1193_s4 + $0x60] sm:$0xff] %v486_v34  ;;  %v495_v35 = vpop.permute.xlu1 %494 }
 0x13d   : > { %v497_v38 = vmul.f32 %v495_v35, %v454_v24 }
 0x140   : > { %v501_v36 = vpop.permute.xlu1 %500 }
 0x141   : > { %v503_v39 = vmul.f32 %v501_v36, %v453_v22 }
 0x143   : > { %v504_v40 = vadd.f32 %v503_v39, %v497_v38 }
 0x145   : > { %505 = vst [vmem:[%s1193_s4 + $0x68] sm:$0xff] %v504_v40  ;;  %v519_v42 = vpop.permute.xlu1 %518 }
 0x146   : > { %v521_v43 = vmul.f32 %v519_v42, %v435_v16 }
 0x148   : > { %v522_v45 = vadd.f32 %v521_v43, %v515_v41 }
 0x14a   : > { %523 = vst [vmem:[%s1193_s4 + $0x70] sm:$0xff] %v522_v45  ;;  %v531_v47 = vpop.permute.xlu1 %530 }
 0x14b   : > { %v533_v48 = vmul.f32 %v531_v47, %v418_v7 }
 0x14d   : > { %v540_v49 = vadd.f32 %v539_v46, %v533_v48 }
 0x14f   : > { %541 = vst [vmem:[%s1193_s4 + $0x78] sm:$0xff] %v540_v49 }
 0x150   : > { %887 = shalt.err (!%p884_p6)
}
 0x151   : > { %s888_s16 = scalar_lea.hbm %s555_s1, 2048  ;;  %s892_s21 = scalar_lea.hbm %s1262_s3, 4096 }
 0x152   : > { %p889_p12 = scmp.ne.s32.totalorder %s555_s1, %s888_s16  ;;  %p893_p5 = scmp.lt.s32.totalorder %s555_s1, %s1262_s3 }
 0x153   : > { %p894_p7 = scmp.lt.s32.totalorder %s892_s21, %s888_s16 }
 0x154   : > { %p890_p0 = pnand %p889_p12, %p1281_p11 }
 0x155   : > { %p895_p2 = por %p894_p7, %p893_p5 }
 0x156   : > { %p891_p4 = pneg %p890_p0 }
 0x158   : > { %p896_p13 = pnand %p895_p2, %p891_p4 }
 0x15a   : > { %899 = shalt.err (!%p896_p13)
}
 0x15b   : > { %698 = dma.vmem_to_hbm [thread:$0]  (%p1281_p11), %s558_s9, 2048, %s555_s1, %s543_s19  }
 0x15c PF: > { %s569_s28 = sand.u32 1, %s930_s12   ;;  %p1282_p8 = scmp.ne.s32.totalorder %s1271_s24, 0 }
 0x15d   : > { %p1283_p10 = scmp.ge.s32.totalorder %s942_s15, 2  ;;  %s570_s8 = scalar_lea.sflag [#allocation4], %s569_s28 }
 0x15f   : > { %p711_p1 = pnand %p1283_p10, %p1282_p8 }
 0x161   : > { %p712_p3 = pneg %p711_p1 }
 0x163   : > { %925 = dma.done.wait (%p712_p3), %s570_s8, 2048  }
 0x164   : > { %927 = vsyncadd (%p712_p3), %s570_s8, 4294965248  ;;  %s1284_s17 = sld [smem:[#allocation12_spill]]  ;;  %p19_p9 = scmp.ge.s32.totalorder %s1009_s18, 4  }
 0x165   : > { %s1285_s12 = smov %s934_s13  ;;  %s1286_s13 = smov %s938_s14 }
 0x166   : > { %s1288_s15 = smov %s1009_s18  ;;  %21 = sbr.rel (!%p19_p9) target bundleno = 10 (0xa), region = 101 }
 0x16a   : > { %s1287_s14 = smov %s1284_s17 }
 0x16b   :  { %575 = vsyncpa [#allocation3], 1 }
 0x16c   :  { %577 = vsyncpa [#allocation3 + $0x1], 1 }
 0x16d   :  { %578 = vsyncpa [#allocation6], 1 }
 0x16e   :  { %580 = vsyncpa [#allocation6 + $0x1], 1 }
 0x16f   :  { %581 = vsyncpa [#allocation4], 1 }
 0x170   :  { %583 = vsyncpa [#allocation4 + $0x1], 1 }

</bundles_post_ra>
